<compile_context>
chip_gen: v7x
topology: tpu7x:2x2x1
jax: 0.10.0
libtpu: 0.0.40
codegen_flags: <defaults>
</compile_context>

<pallas_src>
import functools

import jax
import jax.numpy as jnp
from jax.experimental import pallas as pl
from jax.experimental.pallas import tpu as pltpu


def _batch_id_loss_kernel(pred_ref, tout_ref, loss_ref,
                          pn_sc, m_sc, l_sc, diag_sc, *, mxu_dtype):
    qi = pl.program_id(0)
    ki = pl.program_id(1)

    # --- init per q-tile (ki == 0): normalize pred tile once, reset stats ---
    @pl.when(ki == 0)
    def _init():
        pred = pred_ref[...].astype(jnp.float32)                       # (tq, D)
        # F.normalize(x, dim=-1), eps=1e-12:  x * rsqrt(max(sum(x^2), eps^2))
        inv = jax.lax.rsqrt(
            jnp.maximum(jnp.sum(pred * pred, axis=-1, keepdims=True), 1e-24))
        pn_sc[...] = pred * inv
        m_sc[...] = jnp.full_like(m_sc, -jnp.inf)
        l_sc[...] = jnp.zeros_like(l_sc)
        diag_sc[...] = jnp.zeros_like(diag_sc)

    # --- normalize current k-tile of target_outputs ---
    tout = tout_ref[...].astype(jnp.float32)                           # (tk, D)
    t_inv = jax.lax.rsqrt(
        jnp.maximum(jnp.sum(tout * tout, axis=-1, keepdims=True), 1e-24))
    t_n = tout * t_inv

    # --- logits tile: 5 * pred_n @ t_n.T, contracting last dims on the MXU
    #     (no materialized transpose of t_n). ---
    s = 5.0 * jax.lax.dot_general(
        pn_sc[...].astype(mxu_dtype), t_n.astype(mxu_dtype),
        dimension_numbers=(((1,), (1,)), ((), ())),
        preferred_element_type=jnp.float32)                            # (tq, tk)

    # --- online softmax update (row stats stay (tq, 1)) ---
    m_prev = m_sc[...]
    m_new = jnp.maximum(m_prev, jnp.max(s, axis=-1, keepdims=True))
    alpha = jnp.exp(m_prev - m_new)
    l_sc[...] = alpha * l_sc[...] + jnp.sum(jnp.exp(s - m_new),
                                            axis=-1, keepdims=True)
    m_sc[...] = m_new

    # --- diagonal logits live only in the qi == ki tile (tq == tk); extract
    #     them from the same MXU result used by the softmax path. ---
    @pl.when(qi == ki)
    def _diag():
        tq, tk = s.shape
        rows = jax.lax.broadcasted_iota(jnp.int32, (tq, tk), 0)
        cols = jax.lax.broadcasted_iota(jnp.int32, (tq, tk), 1)
        diag_sc[...] = jnp.sum(jnp.where(rows == cols, s, 0.0),
                               axis=-1, keepdims=True)

    # --- finalize per q-tile: per-row CE loss = logsumexp - diag ---
    @pl.when(ki == pl.num_programs(1) - 1)
    def _finalize():
        lse = m_sc[...] + jnp.log(l_sc[...])
        loss_ref[...] = lse - diag_sc[...]


def batch_id_loss(pred, target_outputs, *, tq=256, tk=256,
                  mxu_dtype=jnp.float32):
    """Contrastive batch-ID cross-entropy loss (mean over batch)."""
    B, D = pred.shape
    tq = min(tq, B)
    tk = min(tk, B)
    assert tq == tk, "diag extraction assumes square logits tiles"
    assert B % tq == 0 and B % tk == 0, "B must be divisible by the tile size"
    assert tq % 8 == 0 and D % 128 == 0, "tiles must respect the (8,128) layout"

    grid = (B // tq, B // tk)
    per_row = pl.pallas_call(
        functools.partial(_batch_id_loss_kernel, mxu_dtype=mxu_dtype),
        out_shape=jax.ShapeDtypeStruct((B, 1), jnp.float32),
        grid_spec=pltpu.PrefetchScalarGridSpec(
            num_scalar_prefetch=0,
            grid=grid,
            in_specs=[
                pl.BlockSpec((tq, D), lambda qi, ki: (qi, 0)),   # pred q-tile
                pl.BlockSpec((tk, D), lambda qi, ki: (ki, 0)),   # t_out k-tile
            ],
            out_specs=pl.BlockSpec((tq, 1), lambda qi, ki: (qi, 0)),
            scratch_shapes=[
                pltpu.VMEM((tq, D), jnp.float32),   # normalized pred q-tile
                pltpu.VMEM((tq, 1), jnp.float32),   # running row max
                pltpu.VMEM((tq, 1), jnp.float32),   # running row sum
                pltpu.VMEM((tq, 1), jnp.float32),   # diagonal logits
            ]),
        compiler_params=pltpu.CompilerParams(
            dimension_semantics=("parallel", "arbitrary")),
    )(pred, target_outputs)
    # Final mean over batch: tiny XLA reduce (kept out of the kernel so the
    # parallel q-tile axis never races on a shared scalar accumulator).
    return jnp.mean(per_row)


def batch_id_loss_forward(pred, target, w, b, **kwargs):
    """Module forward: encoder (hoisted, XLA) + Pallas contrastive loss."""
    # TODO(synk): arbitrary CNN encoder replaced by a linear stand-in; computed
    # outside the kernel (K = D_in too small to amortize an in-kernel MXU pass).
    target_outputs = target.astype(jnp.float32) @ w + b
    return batch_id_loss(pred, target_outputs, **kwargs)


def batch_id_loss_ref(pred, target, w, b):
    """Pure-JAX reference mirroring the PyTorch forward."""
    t_out = target @ w + b
    pn = pred / jnp.maximum(jnp.linalg.norm(pred, axis=-1, keepdims=True), 1e-12)
    tn = t_out / jnp.maximum(jnp.linalg.norm(t_out, axis=-1, keepdims=True), 1e-12)
    logits = 5.0 * pn @ tn.T
    B = pred.shape[0]
    logp = jax.nn.log_softmax(logits, axis=-1)
    return -jnp.mean(logp[jnp.arange(B), jnp.arange(B)])


if __name__ == "__main__":
    key = jax.random.PRNGKey(0)
    k1, k2, k3, k4 = jax.random.split(key, 4)

    # Small but lane-dense shapes; tq=tk=16 exercises a real 2x2 (q,k) grid
    # with the streaming-softmax / diag-tile / parallel-q machinery.
    B, D_in, D = 32, 32, 128
    pred = jax.random.normal(k1, (B, D), dtype=jnp.float32)
    target = jax.random.normal(k2, (B, D_in), dtype=jnp.float32)
    w = jax.random.normal(k3, (D_in, D), dtype=jnp.float32) * (1.0 / jnp.sqrt(D_in))
    b = jax.random.normal(k4, (1, D), dtype=jnp.float32) * 0.01

    loss = batch_id_loss_forward(pred, target, w, b, tq=16, tk=16)
    jax.block_until_ready(loss)

    ref = batch_id_loss_ref(pred, target, w, b)
    assert jnp.allclose(loss, ref, atol=1e-5, rtol=1e-5), (loss, ref)

    print("KERNEL_OK")
</pallas_src>

<mosaic_0001>
module attributes {stable_mosaic.version = 11 : i64} {
  func.func @_batch_id_loss_kernel(%arg0: i32, %arg1: i32, %arg2: memref<16x128xf32, #tpu.memory_space<vmem>>, %arg3: memref<16x128xf32, #tpu.memory_space<vmem>>, %arg4: memref<16x1xf32, #tpu.memory_space<vmem>>, %arg5: memref<16x128xf32, #tpu.memory_space<vmem>>, %arg6: memref<16x1xf32, #tpu.memory_space<vmem>>, %arg7: memref<16x1xf32, #tpu.memory_space<vmem>>, %arg8: memref<16x1xf32, #tpu.memory_space<vmem>>) attributes {dimension_semantics = [#tpu.dimension_semantics<parallel>, #tpu.dimension_semantics<arbitrary>], iteration_bounds = array<i64: 2, 2>, scalar_prefetch = 0 : i64, scratch_operands = 4 : i64, tpu.core_type = #tpu.core_type<tc>, window_params = [{transform_indices = @transform_0, window_bounds = array<i64: 16, 128>}, {transform_indices = @transform_1, window_bounds = array<i64: 16, 128>}, {transform_indices = @transform_2, window_bounds = array<i64: 16, 1>}]} {
    %c0_i32 = arith.constant 0 : i32
    %0 = arith.cmpi eq, %arg1, %c0_i32 : i32
    %1 = arith.extui %0 : i1 to i32
    %c0_i32_0 = arith.constant 0 : i32
    %2 = arith.cmpi ne, %1, %c0_i32_0 : i32
    scf.if %2 {
      %c0_19 = arith.constant 0 : index
      %c0_20 = arith.constant 0 : index
      %38 = vector.load %arg2[%c0_19, %c0_20] : memref<16x128xf32, #tpu.memory_space<vmem>>, vector<16x128xf32>
      %39 = arith.mulf %38, %38 : vector<16x128xf32>
      %cst_21 = arith.constant dense<0.000000e+00> : vector<16xf32>
      %40 = vector.multi_reduction <add>, %39, %cst_21 [1] : vector<16x128xf32> to vector<16xf32>
      %41 = vector.shape_cast %40 : vector<16xf32> to vector<16x1xf32>
      %cst_22 = arith.constant 1.000000e-24 : f32
      %42 = vector.broadcast %cst_22 : f32 to vector<16x1xf32>
      %43 = arith.maximumf %41, %42 : vector<16x1xf32>
      %44 = math.rsqrt %43 : vector<16x1xf32>
      %45 = vector.broadcast %44 : vector<16x1xf32> to vector<16x128xf32>
      %46 = arith.mulf %38, %45 : vector<16x128xf32>
      %c0_23 = arith.constant 0 : index
      %c0_24 = arith.constant 0 : index
      %47 = vector.load %arg5[%c0_23, %c0_24] : memref<16x128xf32, #tpu.memory_space<vmem>>, vector<16x128xf32>
      tpu.vector_store %arg5[%c0_23, %c0_24], %46 {strides = array<i32>} : memref<16x128xf32, #tpu.memory_space<vmem>>, vector<16x128xf32>,
      %cst_25 = arith.constant 0xFF800000 : f32
      %48 = vector.broadcast %cst_25 : f32 to vector<16x1xf32>
      %c0_26 = arith.constant 0 : index
      %c0_27 = arith.constant 0 : index
      %49 = vector.load %arg6[%c0_26, %c0_27] : memref<16x1xf32, #tpu.memory_space<vmem>>, vector<16x1xf32>
      tpu.vector_store %arg6[%c0_26, %c0_27], %48 {strides = array<i32>} : memref<16x1xf32, #tpu.memory_space<vmem>>, vector<16x1xf32>,
      %cst_28 = arith.constant 0.000000e+00 : f32
      %50 = vector.broadcast %cst_28 : f32 to vector<16x1xf32>
      %c0_29 = arith.constant 0 : index
      %c0_30 = arith.constant 0 : index
      %51 = vector.load %arg7[%c0_29, %c0_30] : memref<16x1xf32, #tpu.memory_space<vmem>>, vector<16x1xf32>
      tpu.vector_store %arg7[%c0_29, %c0_30], %50 {strides = array<i32>} : memref<16x1xf32, #tpu.memory_space<vmem>>, vector<16x1xf32>,
      %cst_31 = arith.constant 0.000000e+00 : f32
      %52 = vector.broadcast %cst_31 : f32 to vector<16x1xf32>
      %c0_32 = arith.constant 0 : index
      %c0_33 = arith.constant 0 : index
      %53 = vector.load %arg8[%c0_32, %c0_33] : memref<16x1xf32, #tpu.memory_space<vmem>>, vector<16x1xf32>
      tpu.vector_store %arg8[%c0_32, %c0_33], %52 {strides = array<i32>} : memref<16x1xf32, #tpu.memory_space<vmem>>, vector<16x1xf32>,
    } else {
    }
    %c0 = arith.constant 0 : index
    %c0_1 = arith.constant 0 : index
    %3 = vector.load %arg3[%c0, %c0_1] : memref<16x128xf32, #tpu.memory_space<vmem>>, vector<16x128xf32>
    %4 = arith.mulf %3, %3 : vector<16x128xf32>
    %cst = arith.constant dense<0.000000e+00> : vector<16xf32>
    %5 = vector.multi_reduction <add>, %4, %cst [1] : vector<16x128xf32> to vector<16xf32>
    %6 = vector.shape_cast %5 : vector<16xf32> to vector<16x1xf32>
    %cst_2 = arith.constant 1.000000e-24 : f32
    %7 = vector.broadcast %cst_2 : f32 to vector<16x1xf32>
    %8 = arith.maximumf %6, %7 : vector<16x1xf32>
    %9 = math.rsqrt %8 : vector<16x1xf32>
    %10 = vector.broadcast %9 : vector<16x1xf32> to vector<16x128xf32>
    %11 = arith.mulf %3, %10 : vector<16x128xf32>
    %c0_3 = arith.constant 0 : index
    %c0_4 = arith.constant 0 : index
    %12 = vector.load %arg5[%c0_3, %c0_4] : memref<16x128xf32, #tpu.memory_space<vmem>>, vector<16x128xf32>
    %cst_5 = arith.constant dense<0.000000e+00> : vector<16x16xf32>
    %13 = tpu.matmul %12, %11, %cst_5 {dimension_numbers = #tpu.dot_dimension_numbers<[1], [1], [0], [0], [0, 0, 1, 0], [], []>} : vector<16x128xf32>, vector<16x128xf32>, vector<16x16xf32> -> vector<16x16xf32>
    %cst_6 = arith.constant 5.000000e+00 : f32
    %14 = vector.broadcast %cst_6 : f32 to vector<16x16xf32>
    %15 = arith.mulf %14, %13 : vector<16x16xf32>
    %c0_7 = arith.constant 0 : index
    %c0_8 = arith.constant 0 : index
    %16 = vector.load %arg6[%c0_7, %c0_8] : memref<16x1xf32, #tpu.memory_space<vmem>>, vector<16x1xf32>
    %cst_9 = arith.constant dense<0xFF800000> : vector<16xf32>
    %17 = vector.multi_reduction <maximumf>, %15, %cst_9 [1] : vector<16x16xf32> to vector<16xf32>
    %18 = vector.shape_cast %17 : vector<16xf32> to vector<16x1xf32>
    %19 = arith.maximumf %16, %18 : vector<16x1xf32>
    %20 = arith.subf %16, %19 : vector<16x1xf32>
    %21 = math.exp %20 : vector<16x1xf32>
    %c0_10 = arith.constant 0 : index
    %c0_11 = arith.constant 0 : index
    %22 = vector.load %arg7[%c0_10, %c0_11] : memref<16x1xf32, #tpu.memory_space<vmem>>, vector<16x1xf32>
    %23 = arith.mulf %21, %22 : vector<16x1xf32>
    %24 = vector.broadcast %19 : vector<16x1xf32> to vector<16x16xf32>
    %25 = arith.subf %15, %24 : vector<16x16xf32>
    %26 = math.exp %25 : vector<16x16xf32>
    %cst_12 = arith.constant dense<0.000000e+00> : vector<16xf32>
    %27 = vector.multi_reduction <add>, %26, %cst_12 [1] : vector<16x16xf32> to vector<16xf32>
    %28 = vector.shape_cast %27 : vector<16xf32> to vector<16x1xf32>
    %29 = arith.addf %23, %28 : vector<16x1xf32>
    %c0_13 = arith.constant 0 : index
    %c0_14 = arith.constant 0 : index
    %30 = vector.load %arg7[%c0_13, %c0_14] : memref<16x1xf32, #tpu.memory_space<vmem>>, vector<16x1xf32>
    tpu.vector_store %arg7[%c0_13, %c0_14], %29 {strides = array<i32>} : memref<16x1xf32, #tpu.memory_space<vmem>>, vector<16x1xf32>,
    %c0_15 = arith.constant 0 : index
    %c0_16 = arith.constant 0 : index
    %31 = vector.load %arg6[%c0_15, %c0_16] : memref<16x1xf32, #tpu.memory_space<vmem>>, vector<16x1xf32>
    tpu.vector_store %arg6[%c0_15, %c0_16], %19 {strides = array<i32>} : memref<16x1xf32, #tpu.memory_space<vmem>>, vector<16x1xf32>,
    %32 = arith.cmpi eq, %arg0, %arg1 : i32
    %33 = arith.extui %32 : i1 to i32
    %c0_i32_17 = arith.constant 0 : i32
    %34 = arith.cmpi ne, %33, %c0_i32_17 : i32
    scf.if %34 {
      %38 = tpu.iota {dimensions = array<i32: 0>} : vector<16x16xi32>
      %39 = tpu.iota {dimensions = array<i32: 1>} : vector<16x16xi32>
      %40 = arith.cmpi eq, %38, %39 : vector<16x16xi32>
      %cst_19 = arith.constant 0.000000e+00 : f32
      %41 = vector.broadcast %cst_19 : f32 to vector<16x16xf32>
      %42 = arith.select %40, %15, %41 : vector<16x16xi1>, vector<16x16xf32>
      %cst_20 = arith.constant dense<0.000000e+00> : vector<16xf32>
      %43 = vector.multi_reduction <add>, %42, %cst_20 [1] : vector<16x16xf32> to vector<16xf32>
      %44 = vector.shape_cast %43 : vector<16xf32> to vector<16x1xf32>
      %c0_21 = arith.constant 0 : index
      %c0_22 = arith.constant 0 : index
      %45 = vector.load %arg8[%c0_21, %c0_22] : memref<16x1xf32, #tpu.memory_space<vmem>>, vector<16x1xf32>
      tpu.vector_store %arg8[%c0_21, %c0_22], %44 {strides = array<i32>} : memref<16x1xf32, #tpu.memory_space<vmem>>, vector<16x1xf32>,
    } else {
    }
    %c1_i32 = arith.constant 1 : i32
    %35 = arith.cmpi eq, %arg1, %c1_i32 : i32
    %36 = arith.extui %35 : i1 to i32
    %c0_i32_18 = arith.constant 0 : i32
    %37 = arith.cmpi ne, %36, %c0_i32_18 : i32
    scf.if %37 {
      %c0_19 = arith.constant 0 : index
      %c0_20 = arith.constant 0 : index
      %38 = vector.load %arg6[%c0_19, %c0_20] : memref<16x1xf32, #tpu.memory_space<vmem>>, vector<16x1xf32>
      %c0_21 = arith.constant 0 : index
      %c0_22 = arith.constant 0 : index
      %39 = vector.load %arg7[%c0_21, %c0_22] : memref<16x1xf32, #tpu.memory_space<vmem>>, vector<16x1xf32>
      %40 = math.log %39 : vector<16x1xf32>
      %41 = arith.addf %38, %40 : vector<16x1xf32>
      %c0_23 = arith.constant 0 : index
      %c0_24 = arith.constant 0 : index
      %42 = vector.load %arg8[%c0_23, %c0_24] : memref<16x1xf32, #tpu.memory_space<vmem>>, vector<16x1xf32>
      %43 = arith.subf %41, %42 : vector<16x1xf32>
      %c0_25 = arith.constant 0 : index
      %c0_26 = arith.constant 0 : index
      %44 = vector.load %arg4[%c0_25, %c0_26] : memref<16x1xf32, #tpu.memory_space<vmem>>, vector<16x1xf32>
      tpu.vector_store %arg4[%c0_25, %c0_26], %43 {strides = array<i32>} : memref<16x1xf32, #tpu.memory_space<vmem>>, vector<16x1xf32>,
    } else {
    }
    return
  }
  func.func @transform_0(%arg0: i32, %arg1: i32) -> (i32, i32) {
    %c0_i32 = arith.constant 0 : i32
    %c0_i32_0 = arith.constant 0 : i32
    return %arg0, %c0_i32 : i32, i32
  }
  func.func @transform_1(%arg0: i32, %arg1: i32) -> (i32, i32) {
    %c0_i32 = arith.constant 0 : i32
    %c0_i32_0 = arith.constant 0 : i32
    return %arg1, %c0_i32 : i32, i32
  }
  func.func @transform_2(%arg0: i32, %arg1: i32) -> (i32, i32) {
    %c0_i32 = arith.constant 0 : i32
    %c0_i32_0 = arith.constant 0 : i32
    return %arg0, %c0_i32 : i32, i32
  }
}

</mosaic_0001>

<bundles_post_ra>
// kernel: tpu_custom_call.1
= control target key start
LH: loop header
LB: loop body
LE: loop exit
PB: predicated region body
PF: predicated region fallthrough
CT: control target
= control target key end

     0   :  { %7 = vsyncpa [#allocation7], 0  ;;  %s1162_s0 = inlined_call_operand.hbm [shape: f32[32,128], index: 0, kind: input, shape index: {}]   ;;  %s1163_s1 = inlined_call_operand.hbm [shape: f32[32,128], index: 1, kind: input, shape index: {}]   ;;  %s1164_s2 = inlined_call_operand.vmem [shape: f32[32,1], index: 2, kind: output, shape index: {}]  }
   0x1   :  { %9 = vsyncpa [#allocation7 + $0x1], 0 }
   0x2   :  { %10 = vsyncpa [#allocation9], 0 }
   0x3   :  { %12 = vsyncpa [#allocation9 + $0x1], 0  ;;  %s874_s9 = smov 0   ;;  %s876_s10 = smov 0  }
   0x4   :  { %s878_s11 = smov 0   ;;  %s880_s12 = smov 0  }
   0x5   :  { %s882_s13 = smov 0   ;;  %s884_s14 = smov 0  }
   0x6   :  { %s886_s15 = smov 0   ;;  %s888_s16 = smov 0  }
   0x7   :  { %s890_s17 = smov 0   ;;  %s892_s18 = smov 0  }
   0x8   :  { %s894_s19 = smov 0  }
   0x9 LB: > { %s532_s20 = sadd.s32 4294967295, %s850_s19   ;;  %s30_s21 = sadd.s32 1, %s846_s18  ;;  %s850_s19 = sphi %s894_s19, %s18_s19   ;;  %s846_s18 = sphi %s892_s18, %s1195_s18   ;;  %s842_s17 = sphi %s890_s17, %s1194_s17   ;;  %s838_s16 = sphi %s888_s16, %s1193_s16   ;;  %s834_s15 = sphi %s886_s15, %s1192_s15   ;;  %s830_s14 = sphi %s884_s14, %s1191_s14   ;;  %s826_s13 = sphi %s882_s13, %s1190_s13   ;;  %s822_s12 = sphi %s880_s12, %s1189_s12   ;;  %s818_s11 = sphi %s878_s11, %s1188_s11   ;;  %s814_s10 = sphi %s876_s10, %s1187_s10   ;;  %s810_s9 = sphi %s874_s9, %s1186_s9  }
   0xa   : > { %p44_p0 = scmp.ne.s32.totalorder %s830_s14, %s826_s13  ;;  %p1166_p1 = scmp.eq.s32.totalorder %s850_s19, 0 }
   0xb   : > { %p50_p2 = scmp.ne.s32.totalorder %s826_s13, %s822_s12  ;;  %p933_p3 = scmp.eq.s32.totalorder %s532_s20, 0 }
   0xc   : > { %p46_p4 = por %p1166_p1, %p44_p0  ;;  %p1165_p5 = scmp.lt.s32.totalorder %s850_s19, 4 }
   0xd   : > { %p942_p6 = por %p933_p3, %p50_p2  ;;  %s126_s24 = sand.u32 1, %s830_s14  }
   0xe   : > { %s536_s25 = sshll.u32 %s126_s24, 4  ;;  %s552_s26 = sshll.u32 %s846_s18, 8 }
   0xf   : > { %s1172_s23 = scalar_select %p942_p6, 1, 0 }
  0x10   : > { %s951_s29 = scalar_lea.hbm %s1162_s0, %s552_s26  ;;  %s130_s30 = scalar_lea.vmem [#allocation6], %s536_s25 }
  0x11   : > { %s137_s3 = sshll.u32 %s130_s30, 4  ;;  %p957_p7 = pnand %p1165_p5, %p46_p4  ;;  %s953_s3 = int_to_ptr.vmem [resolvable:$true] %s137_s3 }
  0x12   : > { %s962_s5 = scalar_lea.sflag [#allocation7], %s126_s24  ;;  %s696_s6 = scalar_lea.hbm %s951_s29, 256 }
  0x13   : > { %p697_p9 = scmp.ne.s32.totalorder %s951_s29, %s696_s6  ;;  %p698_p10 = pneg %p957_p7 }
  0x14   : > { %s701_s12 = scalar_lea.hbm %s1162_s0, 512  ;;  %p702_p13 = scmp.lt.u32.totalorder %s951_s29, %s1162_s0 }
  0x15   : > { %p699_p11 = pnand %p698_p10, %p697_p9  ;;  %p703_p0 = scmp.lt.u32.totalorder %s701_s12, %s696_s6 }
  0x16   : > { %p705_p4 = scmp.lt.u32.totalorder %s696_s6, %s951_s29 }
  0x17   : > { %p700_p12 = pneg %p699_p11  ;;  %p704_p2 = por %p703_p0, %p702_p13 }
  0x19   : > { %p706_p5 = por %p705_p4, %p704_p2 }
  0x1b   : > { %p707_p1 = pnand %p706_p5, %p700_p12 }
  0x1d   : > { %710 = shalt.err (!%p707_p1)
}
  0x1e   : > { %s711_s24 = scalar_lea.vmem %s953_s3, 256  ;;  %s852_s26 = smov [#allocation6]  }
  0x1f   : > { %p712_p9 = scmp.ne.s32.totalorder %s953_s3, %s711_s24  ;;  %s716_s27 = sshll.u32 %s852_s26, 4  ;;  %s717_s27 = int_to_ptr.vmem [resolvable:$false] %s716_s27 }
  0x20   : > { %s718_s28 = scalar_lea.vmem %s717_s27, 512  ;;  %p719_p6 = scmp.lt.s32.totalorder %s953_s3, %s717_s27 }
  0x21   : > { %p714_p11 = pnand %p712_p9, %p698_p10  ;;  %p720_p13 = scmp.lt.s32.totalorder %s718_s28, %s711_s24 }
  0x23   : > { %p715_p8 = pneg %p714_p11  ;;  %p721_p0 = por %p720_p13, %p719_p6 }
  0x25   : > { %p722_p2 = pnand %p721_p0, %p715_p8 }
  0x27   : > { %725 = shalt.err (!%p722_p2)
}
  0x28   : > { %s1168_s30 = smov 128   ;;  %s1169_s6 = smov 8  }
  0x29   : > { %576 = dma.hbm_to_vmem [thread:$0]  (!%p957_p7), %s951_s29, 256, %s953_s3, %s962_s5, %s1168_s30, %s1168_s30, %s1169_s6  }
  0x2a   : > { %p166_p1 = scmp.lt.s32.totalorder %s850_s19, 5  ;;  %p1174_p5 = scmp.ge.s32.totalorder %s850_s19, 1 }
  0x2b   : > { %s37_s8 = sadd.s32 1, %s830_s14  ;;  %s27_s12 = sadd.s32 1, %s842_s17 }
  0x2c   : > { %p996_p6 = pnand %p1174_p5, %p166_p1  ;;  %p28_p8 = scmp.ge.s32.totalorder %s27_s12, 2 }
  0x2d   : > { %s63_s20 = sadd.s32 1, %s818_s11  ;;  %p70_p10 = scmp.ne.s32.totalorder %s818_s11, %s814_s10 }
  0x2e   : > { %p76_p12 = scmp.ne.s32.totalorder %s814_s10, %s810_s9  ;;  %s1197_s12 = smov (%p28_p8, %s27_s12), 0 }
  0x2f   : > { %s1199_s21 = smov (!%p28_p8, %s30_s21), %s846_s18  ;;  %s60_s29 = ssub.s32 %s842_s17, %s1197_s12 }
  0x30   : > { %s147_s3 = sand.u32 1, %s818_s11   ;;  %p32_p7 = scmp.ge.s32.totalorder %s1199_s21, 2 }
  0x31   : > { %p61_p4 = scmp.eq.s32.totalorder %s60_s29, 0  ;;  %p1176_p9 = scmp.eq.s32.totalorder %s850_s19, 0 }
  0x32   : > { %p1023_p13 = por %p76_p12, %p933_p3  ;;  %s1201_s21 = smov (%p32_p7, %s1199_s21), 0 }
  0x33   : > { %p1017_p11 = por %p70_p10, %p1176_p9  ;;  %s34_s25 = ssub.s32 %s846_s18, %s1201_s21 }
  0x34   : > { %s1178_s9 = scalar_select %p1023_p13, 1, 0 }
  0x35   : > { %s1030_s5 = scalar_select %p61_p4, %s818_s11, %s63_s20  }
  0x36   : > { %s539_s24 = sshll.u32 %s147_s3, 4  ;;  %p35_p0 = scmp.eq.s32.totalorder %s34_s25, 0 }
  0x37   : > { %s553_s26 = sshll.u32 %s842_s17, 8  ;;  %s151_s27 = scalar_lea.vmem [#allocation8], %s539_s24 }
  0x38   : > { %s158_s28 = sshll.u32 %s151_s27, 4  ;;  %s1041_s6 = scalar_lea.hbm %s1163_s1, %s553_s26  ;;  %s1043_s28 = int_to_ptr.vmem [resolvable:$true] %s158_s28 }
  0x39   : > { %s1036_s29 = scalar_select %p35_p0, %s830_s14, %s37_s8  }
  0x3a   : > { %p1179_p3 = scmp.lt.s32.totalorder %s850_s19, 4  ;;  %s1053_s8 = scalar_lea.sflag [#allocation9], %s147_s3 }
  0x3b   : > { %s726_s25 = scalar_lea.hbm %s1041_s6, 256  ;;  %s731_s4 = scalar_lea.hbm %s1163_s1, 512 }
  0x3c   : > { %p1049_p2 = pnand %p1179_p3, %p1017_p11  ;;  %p727_p1 = scmp.ne.s32.totalorder %s1041_s6, %s726_s25 }
  0x3d   : > { %p732_p12 = scmp.lt.u32.totalorder %s1041_s6, %s1163_s1  ;;  %p733_p7 = scmp.lt.u32.totalorder %s731_s4, %s726_s25 }
  0x3e   : > { %p728_p5 = pneg %p1049_p2  ;;  %p735_p9 = scmp.lt.u32.totalorder %s726_s25, %s1041_s6 }
  0x3f   : > { %p734_p4 = por %p733_p7, %p732_p12 }
  0x40   : > { %p729_p8 = pnand %p728_p5, %p727_p1 }
  0x41   : > { %p736_p11 = por %p735_p9, %p734_p4 }
  0x42   : > { %p730_p10 = pneg %p729_p8 }
  0x44   : > { %p737_p0 = pnand %p736_p11, %p730_p10 }
  0x46   : > { %740 = shalt.err (!%p737_p0)
}
  0x47   : > { %s741_s3 = scalar_lea.vmem %s1043_s28, 256  ;;  %s855_s22 = smov [#allocation8]  }
  0x48   : > { %p742_p3 = scmp.ne.s32.totalorder %s1043_s28, %s741_s3  ;;  %s746_s30 = sshll.u32 %s855_s22, 4  ;;  %s747_s30 = int_to_ptr.vmem [resolvable:$false] %s746_s30 }
  0x49   : > { %s748_s24 = scalar_lea.vmem %s747_s30, 512  ;;  %p749_p13 = scmp.lt.s32.totalorder %s1043_s28, %s747_s30 }
  0x4a   : > { %p744_p1 = pnand %p742_p3, %p728_p5  ;;  %p750_p12 = scmp.lt.s32.totalorder %s748_s24, %s741_s3 }
  0x4c   : > { %p745_p8 = pneg %p744_p1  ;;  %p751_p7 = por %p750_p12, %p749_p13 }
  0x4e   : > { %p752_p4 = pnand %p751_p7, %p745_p8 }
  0x50   : > { %755 = shalt.err (!%p752_p4)
}
  0x51   : > { %s1181_s25 = smov 8   ;;  %s1182_s4 = smov 128  }
  0x52   : > { %579 = dma.hbm_to_vmem [thread:$0]  (!%p1049_p2), %s1041_s6, 256, %s1043_s28, %s1053_s8, %s1182_s4, %s1182_s4, %s1181_s25  }
  0x53   : > { %170 = sbr.rel (%p996_p6) target bundleno = 1119 (0x45f), region = 28  ;;  %s172_s26 = sand.u32 (!%p996_p6), 1, %s826_s13  }
  0x54   : > { %s543_s27 = sshll.u32 (!%p996_p6), %s172_s26, 4  ;;  %s173_s3 = scalar_lea.sflag (!%p996_p6), [#allocation7], %s172_s26 }
  0x55   : > { %s176_s22 = scalar_lea.vmem (!%p996_p6), [#allocation6], %s543_s27  ;;  %p1183_p13 = scmp.ne.s32.totalorder (!%p996_p6), %s1172_s23, 0 }
  0x5a   : > { %801 = dma.done.wait (%p1183_p13), %s173_s3, 256  }
  0x5b   : > { %803 = vsyncadd (%p1183_p13), %s173_s3, 4294967040  ;;  %s181_s20 = sand.u32 1, %s814_s10   ;;  %p1184_p6 = scmp.ne.s32.totalorder %s1178_s9, 0 }
  0x5c   : > { %s1092_s30 = sshll.u32 %s181_s20, 4  ;;  %s182_s6 = scalar_lea.sflag [#allocation9], %s181_s20 }
  0x5d   : > { %s185_s7 = scalar_lea.vmem [#allocation8], %s1092_s30 }
  0x5e   : > { %805 = dma.done.wait (%p1184_p6), %s182_s6, 256  }
  0x5f   : > { %807 = vsyncadd (%p1184_p6), %s182_s6, 4294967040  ;;  %s545_s28 = sshll.u32 %s838_s16, 1  ;;  %p547_p5 = scmp.ne.s32.totalorder %s834_s15, 0 }
  0x60   : > { %p214_p2 = scmp.lt.s32.totalorder %s545_s28, 3  ;;  %v223_v0 = vld [vmem:[%s176_s22] sm:$0xff] (!%p547_p5)  ;;  %v224_v1 = vld [vmem:[%s176_s22 + $0x8] sm:$0xff] (!%p547_p5)  ;;  %vm239_vm0 = vcmask (!%p547_p5), 7168   ;;  %v856_v4 = vmov (!%p547_p5), -inf   ;;  %v857_v5 = vmov (!%p547_p5), 0.0  }
  0x61   : > { %222 = sbr.rel (%p547_p5) target bundleno = 261 (0x105), region = 40  ;;  %v225_v2 = vmul.f32 (!%p547_p5), %v223_v0, %v223_v0  ;;  %v226_v3 = vmul.f32 (!%p547_p5), %v224_v1, %v224_v1  ;;  %240 = vst.msk [vmem:[#allocation3] sm:$0xff] (!%p547_p5), %vm239_vm0, %v856_v4  ;;  %241 = vst.msk [vmem:[#allocation3 + $0x8] sm:$0xff] (!%p547_p5), %vm239_vm0, %v856_v4 }
  0x62   : > { %s1203_s28 = smov (!%p214_p2, %s545_s28), 3  ;;  %242 = vst.msk [vmem:[#allocation4] sm:$0xff] (!%p547_p5), %vm239_vm0, %v857_v5  ;;  %243 = vst.msk [vmem:[#allocation4 + $0x8] sm:$0xff] (!%p547_p5), %vm239_vm0, %v857_v5 }
  0x63   : > { %s546_s8 = sshll.u32 %s1203_s28, 3  ;;  %227 = vadd.xlane.f32.xlu0 (!%p547_p5), %v225_v2  ;;  %244 = vst.msk [vmem:[#allocation5] sm:$0xff] (!%p547_p5), %vm239_vm0, %v857_v5  ;;  %245 = vst.msk [vmem:[#allocation5 + $0x8] sm:$0xff] (!%p547_p5), %vm239_vm0, %v857_v5 }
  0x64   : > { %s1103_s25 = scalar_lea.vmem %s1164_s2, %s546_s8 }
  0x67   : > { %229 = vadd.xlane.f32.xlu0 (!%p547_p5), %v226_v3 }
  0xf0   : > { %v228_v6 = vpop.xlane.xlu0 %227 }
  0xf1   : > { %v231_v7 = vmax.f32 %v228_v6, 1e-24 }
  0xf3   : > { %674 = vrsqrt.f32 %v231_v7 }
  0xf4   : > { %v230_v8 = vpop.xlane.xlu0 %229 }
  0xf5   : > { %v232_v9 = vmax.f32 %v230_v8, 1e-24 }
  0xf7   : > { %676 = vrsqrt.f32 %v232_v9 }
  0xfd   : > { %v675_v10 = vpop.eup %674 }
  0xfe   : > { %v235_v11 = vmul.f32 %v675_v10, %v223_v0 }
 0x100   : > { %237 = vst [vmem:[#allocation2] sm:$0xff] %v235_v11 }
 0x101   : > { %v677_v12 = vpop.eup %676 }
 0x102   : > { %v236_v13 = vmul.f32 %v677_v12, %v224_v1 }
 0x104   : > { %238 = vst [vmem:[#allocation2 + $0x8] sm:$0xff] %v236_v13 }
 0x105 PF: > { %v246_v14 = vld [vmem:[%s185_s7] sm:$0xff]  ;;  %v247_v15 = vld [vmem:[%s185_s7 + $0x8] sm:$0xff]  ;;  %vm341_vm1 = vcmask 130048   ;;  %v858_v35 = vmov 0   ;;  %vm384_vm2 = vcmask 7168   ;;  %p548_p10 = scmp.ne.s32.totalorder %s838_s16, %s834_s15 }
 0x106   : > { %v248_v16 = vmul.f32 %v246_v14, %v246_v14  ;;  %v249_v17 = vmul.f32 %v247_v15, %v247_v15  ;;  %678 = vset.pattern.permute.xlu0 %v858_v35  ;;  %679 = vset.pattern.permute.xlu1 %v858_v35  ;;  %v339_v36 = vld [vmem:[#allocation3] sm:$0xff]  ;;  %v340_v39 = vld [vmem:[#allocation3 + $0x8] sm:$0xff]  ;;  %v356_v57 = vld [vmem:[#allocation4] sm:$0xff]  ;;  %v393_v2 = vlaneseq (!%p548_p10) }
 0x107   : > { %v260_v18 = vld [vmem:[#allocation2] sm:$0xff]  ;;  %v357_v61 = vld [vmem:[#allocation4 + $0x8] sm:$0xff] }
 0x108   : > { %250 = vadd.xlane.f32.xlu0 %v248_v16  ;;  %562 = vmatprep.mubr.f32.mxu0 %v260_v18  ;;  %v394_v3 = vshrl.u32 (!%p548_p10), %v393_v2, 7  ;;  %v397_v4 = vand.u32 (!%p548_p10), 127, %v393_v2 }
 0x10a   : > { %vm398_vm3 = vcmp.eq.s32.totalorder (!%p548_p10), %v394_v3, %v397_v4  ;;  %v395_v5 = vadd.s32 (!%p548_p10), 8, %v394_v3 }
 0x10b   : > { %v261_v28 = vld [vmem:[#allocation2 + $0x8] sm:$0xff] }
 0x10c   : > { %252 = vadd.xlane.f32.xlu0 %v249_v17  ;;  %vm399_vm4 = vcmp.eq.s32.totalorder (!%p548_p10), %v395_v5, %v397_v4 }
 0x195   : > { %v251_v19 = vpop.xlane.xlu0 %250 }
 0x196   : > { %v254_v20 = vmax.f32 %v251_v19, 1e-24 }
 0x198   : > { %680 = vrsqrt.f32 %v254_v20 }
 0x199   : > { %v253_v21 = vpop.xlane.xlu0 %252 }
 0x19a   : > { %v255_v22 = vmax.f32 %v253_v21, 1e-24 }
 0x19c   : > { %682 = vrsqrt.f32 %v255_v22 }
 0x1a2   : > { %v681_v23 = vpop.eup %680 }
 0x1a3   : > { %v258_v25 = vmul.f32 %v681_v23, %v246_v14 }
 0x1a6   : > { %v683_v24 = vpop.eup %682 }
 0x1a7   : > { %v259_v26 = vmul.f32 %v683_v24, %v247_v15 }
 0x1a9   : > { %v565_v27 = vpack.c.bf16 %v259_v26, %v258_v25 }
 0x1ab   : > { %566 = vmatprep.subr.bf16.mxu0 %v565_v27 }
 0x1ac   : > { %568 = vmatpush3.bf16.xpose.msra.mxu0 %v565_v27 }
 0x1b3   : > { %563 = vmatmul.mubr.f32.vlgmr.msra.gmra.mrb[0].mxu0 %v261_v28 }
 0x286   : > { %v564_v29 = vpop.f32.mrb[0].mxu0 }
 0x287   : > { %v328_v30 = vpop.f32.mrb[1].mxu0  ;;  %v338_v32 = vmul.f32 5.0, %v564_v29 }
 0x288   : > { %v337_v31 = vmul.f32 5.0, %v328_v30 }
 0x289   : > { %v345_v34 = vsel %vm341_vm1, %v338_v32, -inf  ;;  %v401_v8 = vsel (!%p548_p10), %vm399_vm4, %v338_v32, 0.0 }
 0x28a   : > { %v342_v33 = vsel %vm341_vm1, %v337_v31, -inf  ;;  %v400_v6 = vsel (!%p548_p10), %vm398_vm3, %v337_v31, 0.0  ;;  %v405_v9 = vsel (!%p548_p10), %vm341_vm1, %v401_v8, 0.0 }
 0x28b   : > { %343 = vmax.xlane.f32.xlu1 %v342_v33  ;;  %v402_v7 = vsel (!%p548_p10), %vm341_vm1, %v400_v6, 0.0 }
 0x28f   : > { %346 = vmax.xlane.f32.xlu1 %v345_v34 }
 0x318   : > { %v344_v37 = vpop.xlane.xlu1 %343 }
 0x319   : > { %v348_v38 = vmax.f32 %v339_v36, %v344_v37 }
 0x31b   : > { %v350_v40 = vsub.f32 %v339_v36, %v348_v38  ;;  %387 = vst.msk [vmem:[#allocation3] sm:$0xff] %vm384_vm2, %v348_v38  ;;  %362 = vperm.xlu0 %678, %v348_v38  }
 0x31c   : > { %v347_v41 = vpop.xlane.xlu1 %346 }
 0x31d   : > { %v349_v42 = vmax.f32 %v340_v39, %v347_v41  ;;  %v352_v54 = vmul.f32 1.442695, %v350_v40 }
 0x31f   : > { %v351_v43 = vsub.f32 %v340_v39, %v349_v42  ;;  %388 = vst.msk [vmem:[#allocation3 + $0x8] sm:$0xff] %vm384_vm2, %v349_v42  ;;  %367 = vperm.xlu1 %679, %v349_v42  }
 0x321   : > { %v354_v55 = vmul.f32 1.442695, %v351_v43 }
 0x39a   : > { %v363_v44 = vpop.permute.xlu0 %362 }
 0x39b   : > { %v370_v45 = vsub.f32 %v337_v31, %v363_v44 }
 0x39d   : > { %v372_v46 = vmul.f32 1.442695, %v370_v45 }
 0x39e   : > { %v368_v47 = vpop.permute.xlu1 %367 }
 0x39f   : > { %684 = vpow2.f32 %v372_v46  ;;  %v371_v48 = vsub.f32 %v338_v32, %v368_v47 }
 0x3a1   : > { %v374_v49 = vmul.f32 1.442695, %v371_v48 }
 0x3a3   : > { %686 = vpow2.f32 %v374_v49 }
 0x3a4   : > { %688 = vpow2.f32 %v352_v54 }
 0x3a5   : > { %690 = vpow2.f32 %v354_v55 }
 0x3a9   : > { %v685_v50 = vpop.eup %684 }
 0x3aa   : > { %v376_v51 = vsel %vm341_vm1, %v685_v50, 0.0 }
 0x3ab   : > { %377 = vadd.xlane.f32.xlu1 %v376_v51 }
 0x3ad   : > { %v687_v52 = vpop.eup %686 }
 0x3ae   : > { %v379_v53 = vsel %vm341_vm1, %v687_v52, 0.0  ;;  %v689_v56 = vpop.eup %688 }
 0x3af   : > { %380 = vadd.xlane.f32.xlu0 %v379_v53  ;;  %v358_v58 = vmul.f32 %v689_v56, %v356_v57  ;;  %v691_v59 = vpop.eup %690 }
 0x3b0   : > { %v359_v63 = vmul.f32 %v691_v59, %v357_v61 }
 0x3b3   : > { %403 = vadd.xlane.f32.xlu0 (!%p548_p10), %v402_v7 }
 0x3b7   : > { %406 = vadd.xlane.f32.xlu0 (!%p548_p10), %v405_v9 }
 0x438   : > { %v378_v60 = vpop.xlane.xlu1 %377 }
 0x439   : > { %v382_v62 = vadd.f32 %v378_v60, %v358_v58  ;;  %392 = sbr.rel (%p548_p10) target bundleno = 1094 (0x446), region = 44 }
 0x43b   : > { %385 = vst.msk [vmem:[#allocation4] sm:$0xff] %vm384_vm2, %v382_v62 }
 0x43c   : > { %v381_v0 = vpop.xlane.xlu0 %380 }
 0x43d   : > { %v383_v1 = vadd.f32 %v381_v0, %v359_v63 }
 0x43f   : > { %386 = vst.msk [vmem:[#allocation4 + $0x8] sm:$0xff] %vm384_vm2, %v383_v1 }
 0x440   : > { %v404_v10 = vpop.xlane.xlu0 %403 }
 0x441   : > { %408 = vst.msk [vmem:[#allocation5] sm:$0xff] %vm384_vm2, %v404_v10 }
 0x444   : > { %v407_v11 = vpop.xlane.xlu0 %406 }
 0x445   : > { %409 = vst.msk [vmem:[#allocation5 + $0x8] sm:$0xff] %vm384_vm2, %v407_v11 }
 0x446 PF: > { %p549_p9 = scmp.ne.s32.totalorder %s834_s15, 1 }
 0x447   : > { %v414_v15 = vld [vmem:[#allocation3] sm:$0xff] (!%p549_p9)  ;;  %v415_v18 = vld [vmem:[#allocation3 + $0x8] sm:$0xff] (!%p549_p9) }
 0x448   : > { %413 = sbr.rel (%p549_p9) target bundleno = 1119 (0x45f), region = 48  ;;  %v416_v12 = vld [vmem:[#allocation4] sm:$0xff] (!%p549_p9)  ;;  %v424_v19 = vld [vmem:[#allocation5] sm:$0xff] (!%p549_p9) }
 0x449   : > { %692 = vlog2.f32 (!%p549_p9), %v416_v12 }
 0x44c   : > { %v417_v13 = vld [vmem:[#allocation4 + $0x8] sm:$0xff] (!%p549_p9)  ;;  %v425_v22 = vld [vmem:[#allocation5 + $0x8] sm:$0xff] (!%p549_p9) }
 0x44d   : > { %694 = vlog2.f32 (!%p549_p9), %v417_v13 }
 0x453   : > { %v693_v14 = vpop.eup %692 }
 0x454   : > { %v419_v17 = vmul.f32 0.6931472, %v693_v14 }
 0x456   : > { %v422_v21 = vadd.f32 %v419_v17, %v414_v15 }
 0x457   : > { %v695_v16 = vpop.eup %694 }
 0x458   : > { %v421_v20 = vmul.f32 0.6931472, %v695_v16  ;;  %v426_v24 = vsub.f32 %v422_v21, %v424_v19 }
 0x45a   : > { %v423_v23 = vadd.f32 %v421_v20, %v415_v18  ;;  %428 = vst.msk [vmem:[%s1103_s25] sm:$0xff] %vm384_vm2, %v426_v24 }
 0x45c   : > { %v427_v25 = vsub.f32 %v423_v23, %v425_v22 }
 0x45e   : > { %429 = vst.msk [vmem:[%s1103_s25 + $0x8] sm:$0xff] %vm384_vm2, %v427_v25 }
 0x45f PF: > { %s18_s19 = sadd.s32 1, %s850_s19   ;;  %s1185_s4 = smov %s1197_s12 }
 0x460   : > { %p15_p11 = scmp.ge.s32.totalorder %s18_s19, 6   ;;  %s1186_s9 = smov %s814_s10 }
 0x461   : > { %s1187_s10 = smov %s818_s11  ;;  %s1188_s11 = smov %s1030_s5 }
 0x462   : > { %s1189_s12 = smov %s826_s13  ;;  %s1190_s13 = smov %s830_s14 }
 0x463   : > { %s1191_s14 = smov %s1036_s29  ;;  %s1192_s15 = smov %s842_s17 }
 0x464   : > { %s1193_s16 = smov %s846_s18  ;;  %s1194_s17 = smov %s1185_s4 }
 0x465   : > { %s1195_s18 = smov %s1201_s21  ;;  %17 = sbr.rel (!%p15_p11) target bundleno = 9 (0x9), region = 93 }
 0x46c   :  { %452 = vsyncpa [#allocation7], 1 }
 0x46d   :  { %454 = vsyncpa [#allocation7 + $0x1], 1 }
 0x46e   :  { %455 = vsyncpa [#allocation9], 1 }
 0x46f   :  { %457 = vsyncpa [#allocation9 + $0x1], 1 }

</bundles_post_ra>
